<compile_context>
chip_gen: v7x
topology: tpu7x:2x2x1
jax: 0.10.0
libtpu: 0.0.40
codegen_flags: <defaults>
</compile_context>

<pallas_src>
import jax
import jax.numpy as jnp
from jax.experimental import pallas as pl
from jax.experimental.pallas import tpu as pltpu


def _round_up(n, m):
    return ((n + m - 1) // m) * m


def _cdiv(a, b):
    return (a + b - 1) // b


def _ffn_kernel(x_ref, w1a_ref, w1g_ref, b1a_ref, b1g_ref, w2_ref, b2_ref, o_ref):
    # x_ref:   (TM, Dp)   token tile x (padded) features       [matmul dtype]
    # w1a_ref: (Dp, Hp)   "value" half of Linear1              [matmul dtype]
    # w1g_ref: (Dp, Hp)   "gate"  half of Linear1              [matmul dtype]
    # b1a_ref, b1g_ref: (1, Hp)  f32
    # w2_ref:  (Hp, Dp)                                        [matmul dtype]
    # b2_ref:  (1, Dp)  f32
    x = x_ref[...]

    # Linear1 as two dots (halves split host-side: no (TM, 2H) intermediate and
    # no in-kernel slicing).  MXU with f32 accumulation.
    a = jnp.dot(x, w1a_ref[...], preferred_element_type=jnp.float32) + b1a_ref[...]
    g = jnp.dot(x, w1g_ref[...], preferred_element_type=jnp.float32) + b1g_ref[...]

    # GEGLU: a * gelu(g), exact erf-based gelu (matches F.gelu default).
    # Elementwise math stays f32 (exact semantics; v5e has no bf16 VPU/EUP path).
    inv_sqrt2 = jnp.float32(0.7071067811865476)
    gelu_g = 0.5 * g * (1.0 + jax.lax.erf(g * inv_sqrt2))
    ge = a * gelu_g

    # Linear2 (MXU), f32 accumulation; bias added once on the (TM, Dp) tile.
    out = jnp.dot(ge.astype(w2_ref.dtype), w2_ref[...],
                  preferred_element_type=jnp.float32) + b2_ref[...]

    # Dropout(p=0.0) is identity -> nothing to do.
    o_ref[...] = out.astype(o_ref.dtype)


def feed_forward_pallas(x, w1, b1, w2, b2, *, tm=512, matmul_dtype=jnp.bfloat16):
    """Perceiver FeedForward forward pass.

    x: (B, S, D). w1: (D, 2*H), b1: (2*H,), w2: (H, D), b2: (D,).

    matmul_dtype: dtype of the MXU operands (default bf16 -> MXU-native on
    v5e/v6e/v7x, f32 accumulation).  Pass None to keep x's dtype (exact f32).
    """
    B, S, D = x.shape
    H2 = w1.shape[1]
    H = H2 // 2
    assert w1.shape == (D, 2 * H)
    assert b1.shape == (2 * H,)
    assert w2.shape == (H, D)
    assert b2.shape == (D,)

    M = B * S
    mm_dtype = x.dtype if matmul_dtype is None else matmul_dtype
    mm_itemsize = jnp.dtype(mm_dtype).itemsize
    out_itemsize = jnp.dtype(x.dtype).itemsize

    # Split packed Linear1 into GEGLU halves host-side (matches chunk(2, -1)).
    w1a, w1g = w1[:, :H], w1[:, H:]
    b1a, b1g = b1[:H], b1[H:]

    # Lane-dense feature padding (only when needed).  Zero padding is exact:
    # padded D columns contribute 0 to the dots, padded H columns have zero
    # bias so gelu(0) = 0 kills them before Linear2.
    Dp = _round_up(D, 128)
    Hp = _round_up(H, 128)
    pad_d, pad_h = Dp - D, Hp - H

    # ---- token-tile (TM) selection -------------------------------------------
    min_tile = 16 if mm_itemsize < 4 else 8   # sublane packing for bf16

    def vmem_bytes(tm_):
        # Single-buffered resident weights + double-buffered x/out tiles +
        # (TM, Hp) f32 intermediates (a, g, gelu_g, ge) as compiler scratch.
        weights = 3 * Dp * Hp * mm_itemsize + (2 * Hp + Dp) * 4
        bufs = 2 * tm_ * Dp * mm_itemsize + 2 * tm_ * Dp * out_itemsize
        inter = 4 * tm_ * Hp * 4
        return weights + bufs + inter

    budget = 40 * 1024 * 1024   # working budget: leaves headroom on v7x (64 MiB/TC)

    if M <= min_tile:
        TM = M                                   # full-dim block is always legal
    else:
        TM = min(tm, M)
        TM = max(min_tile, (TM // min_tile) * min_tile)   # round down, <= M
        while TM > min_tile and vmem_bytes(TM) > budget:
            TM = max(min_tile, (TM // 2 // min_tile) * min_tile)
        # v7x megacore: prefer >= 2 (ideally an even number of) M tiles so both
        # TensorCores get balanced work.  No effect on v5e/v6e (1 TC).
        g = _cdiv(M, TM)
        if M >= 2 * min_tile:
            if g == 1:
                TM = _round_up(_cdiv(M, 2), min_tile)
            elif g % 2 == 1:
                tm2 = _round_up(_cdiv(M, g + 1), min_tile)
                if tm2 <= TM and _cdiv(M, tm2) % 2 == 0 and vmem_bytes(tm2) <= budget:
                    TM = tm2
    num_m = _cdiv(M, TM)

    # ---- host-side operand prep (no M padding, no output row slice) ----------
    x2 = x.reshape(M, D).astype(mm_dtype)
    if pad_d:
        x2 = jnp.pad(x2, ((0, 0), (0, pad_d)))
    w1a_p = jnp.pad(w1a, ((0, pad_d), (0, pad_h))).astype(mm_dtype) if (pad_d or pad_h) \
        else w1a.astype(mm_dtype)
    w1g_p = jnp.pad(w1g, ((0, pad_d), (0, pad_h))).astype(mm_dtype) if (pad_d or pad_h) \
        else w1g.astype(mm_dtype)
    w2_p = jnp.pad(w2, ((0, pad_h), (0, pad_d))).astype(mm_dtype) if (pad_d or pad_h) \
        else w2.astype(mm_dtype)
    b1a_p = jnp.pad(b1a, (0, pad_h)).reshape(1, Hp).astype(jnp.float32)
    b1g_p = jnp.pad(b1g, (0, pad_h)).reshape(1, Hp).astype(jnp.float32)
    b2_p = jnp.pad(b2, (0, pad_d)).reshape(1, Dp).astype(jnp.float32)

    # ---- compiler params / cost estimate --------------------------------------
    vmem_limit = min(56 * 1024 * 1024,
                     max(16 * 1024 * 1024, (vmem_bytes(TM) * 3) // 2))
    cost = pl.CostEstimate(
        flops=6 * M * D * H,                       # 2*M*D*2H + 2*M*H*D
        transcendentals=M * H,                     # erf per gate element
        bytes_accessed=(M * Dp * mm_itemsize + M * Dp * out_itemsize
                        + 3 * Dp * Hp * mm_itemsize + (2 * Hp + Dp) * 4),
    )

    resident = lambda shape: pl.BlockSpec(shape, lambda i: (0, 0),
                                          pipeline_mode=pl.Buffered(1))

    out_p = pl.pallas_call(
        _ffn_kernel,
        out_shape=jax.ShapeDtypeStruct((M, Dp), x.dtype),
        grid_spec=pltpu.PrefetchScalarGridSpec(
            num_scalar_prefetch=0,
            grid=(num_m,),
            in_specs=[
                pl.BlockSpec((TM, Dp), lambda i: (i, 0)),   # x tile (pipelined)
                resident((Dp, Hp)),                         # w1a (resident, 1 buffer)
                resident((Dp, Hp)),                         # w1g
                resident((1, Hp)),                          # b1a
                resident((1, Hp)),                          # b1g
                resident((Hp, Dp)),                         # w2
                resident((1, Dp)),                          # b2
            ],
            out_specs=pl.BlockSpec((TM, Dp), lambda i: (i, 0)),
        ),
        compiler_params=pltpu.CompilerParams(
            dimension_semantics=("parallel",),              # megacore-shard M (v7x)
            vmem_limit_bytes=int(vmem_limit),
        ),
        cost_estimate=cost,
    )(x2, w1a_p, w1g_p, b1a_p, b1g_p, w2_p, b2_p)

    out = out_p if pad_d == 0 else out_p[:, :D]
    return out.reshape(B, S, D)


def _reference(x, w1, b1, w2, b2):
    h = jnp.einsum("bsd,dh->bsh", x, w1) + b1
    a, g = jnp.split(h, 2, axis=-1)
    ge = a * jax.nn.gelu(g, approximate=False)
    return jnp.einsum("bsh,hd->bsd", ge, w2) + b2


def _make_params(key, D, H, dtype=jnp.float32):
    k_w1, k_b1, k_w2, k_b2 = jax.random.split(key, 4)
    lim1 = 1.0 / (D ** 0.5)
    lim2 = 1.0 / (H ** 0.5)
    w1 = jax.random.uniform(k_w1, (D, 2 * H), minval=-lim1, maxval=lim1, dtype=dtype)
    b1 = jax.random.uniform(k_b1, (2 * H,), minval=-lim1, maxval=lim1, dtype=dtype)
    w2 = jax.random.uniform(k_w2, (H, D), minval=-lim2, maxval=lim2, dtype=dtype)
    b2 = jax.random.uniform(k_b2, (D,), minval=-lim2, maxval=lim2, dtype=dtype)
    return w1, b1, w2, b2


if __name__ == "__main__":
    key = jax.random.PRNGKey(0)
    k_small, k_big, k_params = jax.random.split(key, 3)

    # Small shape consistent with the module: dim=32, mult=4 -> hidden=128.
    B, S, D, MULT = 2, 8, 32, 4
    H = D * MULT
    w1, b1, w2, b2 = _make_params(k_params, D, H)

    x = jax.random.normal(k_small, (B, S, D), dtype=jnp.float32)
    ref = _reference(x, w1, b1, w2, b2)

    # Exact f32 MXU path: tight tolerance validates semantics / padding / tiling.
    out_f32 = jax.block_until_ready(
        feed_forward_pallas(x, w1, b1, w2, b2, matmul_dtype=None))
    assert out_f32.shape == (B, S, D)
    assert jnp.allclose(out_f32, ref, atol=1e-5, rtol=1e-5), "f32 mismatch (small)"

    # Default bf16-operand MXU path (f32 accumulation): looser tolerance from
    # bf16 operand rounding only.
    out_bf16 = jax.block_until_ready(feed_forward_pallas(x, w1, b1, w2, b2))
    assert out_bf16.shape == (B, S, D)
    assert jnp.allclose(out_bf16, ref, atol=5e-2, rtol=5e-2), "bf16 mismatch (small)"

    # Larger M, not a multiple of the tile -> exercises M tiling with a ragged
    # last tile and no host-side M padding.  M = 600 -> TM = 512, grid = (2,).
    B2, S2 = 2, 300
    x2 = jax.random.normal(k_big, (B2, S2, D), dtype=jnp.float32)
    ref2 = _reference(x2, w1, b1, w2, b2)

    out2_f32 = jax.block_until_ready(
        feed_forward_pallas(x2, w1, b1, w2, b2, matmul_dtype=None))
    assert out2_f32.shape == (B2, S2, D)
    assert jnp.allclose(out2_f32, ref2, atol=1e-5, rtol=1e-5), "f32 mismatch (tiled)"

    out2_bf16 = jax.block_until_ready(feed_forward_pallas(x2, w1, b1, w2, b2))
    assert jnp.allclose(out2_bf16, ref2, atol=5e-2, rtol=5e-2), "bf16 mismatch (tiled)"

    print("KERNEL_OK")
</pallas_src>

<mosaic_0001>
module attributes {stable_mosaic.version = 11 : i64} {
  func.func @_ffn_kernel(%arg0: i32, %arg1: memref<8x128xf32, #tpu.memory_space<vmem>>, %arg2: memref<128x128xf32, #tpu.memory_space<vmem>>, %arg3: memref<128x128xf32, #tpu.memory_space<vmem>>, %arg4: memref<1x128xf32, #tpu.memory_space<vmem>>, %arg5: memref<1x128xf32, #tpu.memory_space<vmem>>, %arg6: memref<128x128xf32, #tpu.memory_space<vmem>>, %arg7: memref<1x128xf32, #tpu.memory_space<vmem>>, %arg8: memref<8x128xf32, #tpu.memory_space<vmem>>) attributes {dimension_semantics = [#tpu.dimension_semantics<parallel>], iteration_bounds = array<i64: 2>, scalar_prefetch = 0 : i64, scratch_operands = 0 : i64, tpu.core_type = #tpu.core_type<tc>, window_params = [{transform_indices = @transform_0, window_bounds = array<i64: 8, 128>}, {pipeline_mode = #tpu.pipeline_mode<synchronous>, transform_indices = @transform_1, window_bounds = array<i64: 128, 128>}, {pipeline_mode = #tpu.pipeline_mode<synchronous>, transform_indices = @transform_2, window_bounds = array<i64: 128, 128>}, {pipeline_mode = #tpu.pipeline_mode<synchronous>, transform_indices = @transform_3, window_bounds = array<i64: 1, 128>}, {pipeline_mode = #tpu.pipeline_mode<synchronous>, transform_indices = @transform_4, window_bounds = array<i64: 1, 128>}, {pipeline_mode = #tpu.pipeline_mode<synchronous>, transform_indices = @transform_5, window_bounds = array<i64: 128, 128>}, {pipeline_mode = #tpu.pipeline_mode<synchronous>, transform_indices = @transform_6, window_bounds = array<i64: 1, 128>}, {transform_indices = @transform_7, window_bounds = array<i64: 8, 128>}]} {
    %c0 = arith.constant 0 : index
    %c0_0 = arith.constant 0 : index
    %0 = vector.load %arg1[%c0, %c0_0] : memref<8x128xf32, #tpu.memory_space<vmem>>, vector<8x128xf32>
    %c0_1 = arith.constant 0 : index
    %c0_2 = arith.constant 0 : index
    %1 = vector.load %arg2[%c0_1, %c0_2] : memref<128x128xf32, #tpu.memory_space<vmem>>, vector<128x128xf32>
    %cst = arith.constant dense<0.000000e+00> : vector<8x128xf32>
    %2 = tpu.matmul %0, %1, %cst {dimension_numbers = #tpu.dot_dimension_numbers<[1], [0], [0], [1], [0, 0, 1, 1], [], []>} : vector<8x128xf32>, vector<128x128xf32>, vector<8x128xf32> -> vector<8x128xf32>
    %c0_3 = arith.constant 0 : index
    %c0_4 = arith.constant 0 : index
    %3 = vector.load %arg4[%c0_3, %c0_4] : memref<1x128xf32, #tpu.memory_space<vmem>>, vector<1x128xf32>
    %4 = vector.broadcast %3 : vector<1x128xf32> to vector<8x128xf32>
    %5 = arith.addf %2, %4 : vector<8x128xf32>
    %c0_5 = arith.constant 0 : index
    %c0_6 = arith.constant 0 : index
    %6 = vector.load %arg3[%c0_5, %c0_6] : memref<128x128xf32, #tpu.memory_space<vmem>>, vector<128x128xf32>
    %cst_7 = arith.constant dense<0.000000e+00> : vector<8x128xf32>
    %7 = tpu.matmul %0, %6, %cst_7 {dimension_numbers = #tpu.dot_dimension_numbers<[1], [0], [0], [1], [0, 0, 1, 1], [], []>} : vector<8x128xf32>, vector<128x128xf32>, vector<8x128xf32> -> vector<8x128xf32>
    %c0_8 = arith.constant 0 : index
    %c0_9 = arith.constant 0 : index
    %8 = vector.load %arg5[%c0_8, %c0_9] : memref<1x128xf32, #tpu.memory_space<vmem>>, vector<1x128xf32>
    %9 = vector.broadcast %8 : vector<1x128xf32> to vector<8x128xf32>
    %10 = arith.addf %7, %9 : vector<8x128xf32>
    %cst_10 = arith.constant 5.000000e-01 : f32
    %11 = vector.broadcast %cst_10 : f32 to vector<8x128xf32>
    %12 = arith.mulf %11, %10 : vector<8x128xf32>
    %cst_11 = arith.constant 0.707106769 : f32
    %13 = vector.broadcast %cst_11 : f32 to vector<8x128xf32>
    %14 = arith.mulf %10, %13 : vector<8x128xf32>
    %15 = math.erf %14 : vector<8x128xf32>
    %cst_12 = arith.constant 1.000000e+00 : f32
    %16 = vector.broadcast %cst_12 : f32 to vector<8x128xf32>
    %17 = arith.addf %16, %15 : vector<8x128xf32>
    %18 = arith.mulf %12, %17 : vector<8x128xf32>
    %19 = arith.mulf %5, %18 : vector<8x128xf32>
    %c0_13 = arith.constant 0 : index
    %c0_14 = arith.constant 0 : index
    %20 = vector.load %arg6[%c0_13, %c0_14] : memref<128x128xf32, #tpu.memory_space<vmem>>, vector<128x128xf32>
    %cst_15 = arith.constant dense<0.000000e+00> : vector<8x128xf32>
    %21 = tpu.matmul %19, %20, %cst_15 {dimension_numbers = #tpu.dot_dimension_numbers<[1], [0], [0], [1], [0, 0, 1, 1], [], []>} : vector<8x128xf32>, vector<128x128xf32>, vector<8x128xf32> -> vector<8x128xf32>
    %c0_16 = arith.constant 0 : index
    %c0_17 = arith.constant 0 : index
    %22 = vector.load %arg7[%c0_16, %c0_17] : memref<1x128xf32, #tpu.memory_space<vmem>>, vector<1x128xf32>
    %23 = vector.broadcast %22 : vector<1x128xf32> to vector<8x128xf32>
    %24 = arith.addf %21, %23 : vector<8x128xf32>
    %c0_18 = arith.constant 0 : index
    %c0_19 = arith.constant 0 : index
    %25 = vector.load %arg8[%c0_18, %c0_19] : memref<8x128xf32, #tpu.memory_space<vmem>>, vector<8x128xf32>
    tpu.vector_store %arg8[%c0_18, %c0_19], %24 {strides = array<i32>} : memref<8x128xf32, #tpu.memory_space<vmem>>, vector<8x128xf32>,
    return
  }
  func.func @transform_0(%arg0: i32) -> (i32, i32) {
    %c0_i32 = arith.constant 0 : i32
    %c0_i32_0 = arith.constant 0 : i32
    return %arg0, %c0_i32 : i32, i32
  }
  func.func @transform_1(%arg0: i32) -> (i32, i32) {
    %c0_i32 = arith.constant 0 : i32
    %c0_i32_0 = arith.constant 0 : i32
    %c0_i32_1 = arith.constant 0 : i32
    return %c0_i32, %c0_i32_0 : i32, i32
  }
  func.func @transform_2(%arg0: i32) -> (i32, i32) {
    %c0_i32 = arith.constant 0 : i32
    %c0_i32_0 = arith.constant 0 : i32
    %c0_i32_1 = arith.constant 0 : i32
    return %c0_i32, %c0_i32_0 : i32, i32
  }
  func.func @transform_3(%arg0: i32) -> (i32, i32) {
    %c0_i32 = arith.constant 0 : i32
    %c0_i32_0 = arith.constant 0 : i32
    %c0_i32_1 = arith.constant 0 : i32
    return %c0_i32, %c0_i32_0 : i32, i32
  }
  func.func @transform_4(%arg0: i32) -> (i32, i32) {
    %c0_i32 = arith.constant 0 : i32
    %c0_i32_0 = arith.constant 0 : i32
    %c0_i32_1 = arith.constant 0 : i32
    return %c0_i32, %c0_i32_0 : i32, i32
  }
  func.func @transform_5(%arg0: i32) -> (i32, i32) {
    %c0_i32 = arith.constant 0 : i32
    %c0_i32_0 = arith.constant 0 : i32
    %c0_i32_1 = arith.constant 0 : i32
    return %c0_i32, %c0_i32_0 : i32, i32
  }
  func.func @transform_6(%arg0: i32) -> (i32, i32) {
    %c0_i32 = arith.constant 0 : i32
    %c0_i32_0 = arith.constant 0 : i32
    %c0_i32_1 = arith.constant 0 : i32
    return %c0_i32, %c0_i32_0 : i32, i32
  }
  func.func @transform_7(%arg0: i32) -> (i32, i32) {
    %c0_i32 = arith.constant 0 : i32
    %c0_i32_0 = arith.constant 0 : i32
    return %arg0, %c0_i32 : i32, i32
  }
}

</mosaic_0001>

<bundles_post_ra>
// kernel: tpu_custom_call.1
= control target key start
LH: loop header
LB: loop body
LE: loop exit
PB: predicated region body
PF: predicated region fallthrough
CT: control target
= control target key end

     0   :  { %12 = vsyncpa [#allocation3], 0  ;;  %s1620_s0 = inlined_call_operand.hbm [shape: f32[16,128], index: 0, kind: input, shape index: {}]   ;;  %s1621_s1 = inlined_call_operand.hbm [shape: f32[128,128], index: 1, kind: input, shape index: {}]   ;;  %s1622_s2 = inlined_call_operand.hbm [shape: f32[128,128], index: 2, kind: input, shape index: {}]   ;;  %s1623_s3 = inlined_call_operand.vmem [shape: f32[1,128], index: 3, kind: input, shape index: {}]   ;;  %s1624_s4 = inlined_call_operand.vmem [shape: f32[1,128], index: 4, kind: input, shape index: {}]   ;;  %s1625_s5 = inlined_call_operand.hbm [shape: f32[128,128], index: 5, kind: input, shape index: {}]   ;;  %s1626_s6 = inlined_call_operand.vmem [shape: f32[1,128], index: 6, kind: input, shape index: {}]   ;;  %s1627_s7 = inlined_call_operand.hbm [shape: f32[16,128], index: 7, kind: output, shape index: {}]  }
   0x1   :  { %14 = vsyncpa [#allocation3 + $0x1], 0 }
   0x2   :  { %15 = vsyncpa [#allocation6], 0 }
   0x3   :  { %16 = vsyncpa [#allocation9], 0 }
   0x4   :  { %17 = vsyncpa [#allocation4], 0 }
   0x5   :  { %19 = vsyncpa [#allocation4 + $0x1], 0  ;;  %s1311_s24 = smov 0   ;;  %s1313_s25 = smov 0  }
   0x6   :  { %s1315_s26 = smov 0   ;;  %s1317_s27 = smov 0  }
   0x7 LB: > { %s1332_s28 = sadd.s32 4294967295, %s1259_s27   ;;  %s738_s29 = sadd.s32 4294967294, %s1259_s27   ;;  %s1259_s27 = sphi %s1317_s27, %s1653_s27   ;;  %s1255_s26 = sphi %s1315_s26, %s1652_s26   ;;  %s1251_s25 = sphi %s1313_s25, %s1651_s25   ;;  %s1247_s24 = sphi %s1311_s24, %s1650_s24  }
   0x8   : > { %p45_p0 = scmp.ne.s32.totalorder %s1251_s25, %s1247_s24  ;;  %p1628_p1 = scmp.eq.s32.totalorder %s1332_s28, 0 }
   0x9   : > { %p201_p3 = scmp.eq.s32.totalorder %s738_s29, 1  ;;  %p739_p5 = scmp.ge.s32.totalorder %s1259_s27, 1 }
   0xa   : > { %p1341_p4 = por %p1628_p1, %p45_p0  ;;  %p208_p7 = scmp.lt.s32.totalorder %s1259_s27, 3 }
   0xb   : > { %p1346_p6 = por %p201_p3, %p45_p0  ;;  %s1261_s10 = smov [#allocation5]  }
   0xc   : > { %s1632_s30 = scalar_select %p1341_p4, 1, 0 }
   0xd   : > { %s1633_s8 = scalar_select %p1346_p6, 1, 0 }
   0xe   : > { %p1351_p8 = pnand %p739_p5, %p208_p7  ;;  %s220_s11 = sshll.u32 %s1261_s10, 4  ;;  %s1355_s11 = int_to_ptr.vmem [resolvable:$true] %s220_s11 }
   0xf   : > { %1634 = sst [smem:[#allocation15_spill]] %s1633_s8  ;;  %s1262_s13 = smov [#allocation7]  }
  0x10   : > { %s1635_s9 = scalar_select %p1351_p8, 1, 0 }
  0x11   : > { %p1003_p9 = pneg %p1351_p8  ;;  %s233_s14 = sshll.u32 %s1262_s13, 4  ;;  %s1366_s14 = int_to_ptr.vmem [resolvable:$true] %s233_s14 }
  0x12   : > { %s1263_s15 = smov [#allocation8]   ;;  %s1071_s19 = scalar_lea.hbm %s1621_s1, 2048 }
  0x13   : > { %p1362_p11 = pnand %p1003_p9, %p1628_p1  ;;  %s1368_s16 = sshll.u32 %s1263_s15, 4  ;;  %s253_s16 = int_to_ptr.vmem [resolvable:$true] %s1368_s16 }
  0x14   : > { %p1072_p12 = scmp.ne.s32.totalorder %s1621_s1, %s1071_s19  ;;  %p1078_p5 = scmp.lt.u32.totalorder %s1071_s19, %s1621_s1 }
  0x15   : > { %p1378_p13 = pneg %p1362_p11 }
  0x17   : > { %p1074_p0 = pnand %p1378_p13, %p1072_p12 }
  0x19   : > { %p1075_p3 = pneg %p1074_p0 }
  0x1b   : > { %p1080_p7 = pnand %p1078_p5, %p1075_p3 }
  0x1d   : > { %1083 = shalt.err (!%p1080_p7)
}
  0x1e   : > { %s1084_s10 = scalar_lea.vmem %s1355_s11, 2048  ;;  %p1092_p2 = scmp.lt.s32.totalorder %s1355_s11, %s1355_s11 }
  0x1f   : > { %p1085_p9 = scmp.ne.s32.totalorder %s1355_s11, %s1084_s10  ;;  %p1093_p6 = scmp.lt.s32.totalorder %s1084_s10, %s1084_s10 }
  0x21   : > { %p1087_p10 = pnand %p1085_p9, %p1378_p13  ;;  %p1094_p12 = por %p1093_p6, %p1092_p2 }
  0x23   : > { %p1088_p1 = pneg %p1087_p10 }
  0x25   : > { %p1095_p0 = pnand %p1094_p12, %p1088_p1 }
  0x27   : > { %1098 = shalt.err (!%p1095_p0)
}
  0x28   : > { %s1264_s13 = smov 128   ;;  %s1265_s15 = smov 8  }
  0x29   : > { %1006 = dma.hbm_to_vmem [thread:$0]  (!%p1362_p11), %s1621_s1, 2048, %s1355_s11, [#allocation6], %s1264_s13, %s1264_s13, %s1265_s15  }
  0x2a   : > { %s1099_s21 = scalar_lea.hbm %s1622_s2, 2048 }
  0x2b   : > { %p1100_p1 = scmp.ne.s32.totalorder %s1622_s2, %s1099_s21  ;;  %p1106_p10 = scmp.lt.u32.totalorder %s1099_s21, %s1622_s2 }
  0x2d   : > { %p1102_p2 = pnand %p1100_p1, %p1378_p13 }
  0x2f   : > { %p1103_p6 = pneg %p1102_p2 }
  0x31   : > { %p1108_p3 = pnand %p1106_p10, %p1103_p6 }
  0x33   : > { %1111 = shalt.err (!%p1108_p3)
}
  0x34   : > { %s1112_s11 = scalar_lea.vmem %s1366_s14, 2048  ;;  %p1120_p12 = scmp.lt.s32.totalorder %s1366_s14, %s1366_s14 }
  0x35   : > { %p1113_p5 = scmp.ne.s32.totalorder %s1366_s14, %s1112_s11  ;;  %p1121_p0 = scmp.lt.s32.totalorder %s1112_s11, %s1112_s11 }
  0x37   : > { %p1115_p7 = pnand %p1113_p5, %p1378_p13  ;;  %p1122_p1 = por %p1121_p0, %p1120_p12 }
  0x39   : > { %p1116_p9 = pneg %p1115_p7 }
  0x3b   : > { %p1123_p2 = pnand %p1122_p1, %p1116_p9 }
  0x3d   : > { %1126 = shalt.err (!%p1123_p2)
}
  0x3e   : > { %1009 = dma.hbm_to_vmem [thread:$0]  (!%p1362_p11), %s1622_s2, 2048, %s1366_s14, [#allocation6], %s1264_s13, %s1264_s13, %s1265_s15  }
  0x3f   : > { %s1127_s20 = scalar_lea.hbm %s1625_s5, 2048 }
  0x40   : > { %p1128_p6 = scmp.ne.s32.totalorder %s1625_s5, %s1127_s20  ;;  %p1134_p5 = scmp.lt.u32.totalorder %s1127_s20, %s1625_s5 }
  0x42   : > { %p1130_p10 = pnand %p1128_p6, %p1378_p13 }
  0x44   : > { %p1131_p3 = pneg %p1130_p10 }
  0x46   : > { %p1136_p7 = pnand %p1134_p5, %p1131_p3 }
  0x48   : > { %1139 = shalt.err (!%p1136_p7)
}
  0x49   : > { %s1140_s11 = scalar_lea.vmem %s253_s16, 2048  ;;  %p1148_p1 = scmp.lt.s32.totalorder %s253_s16, %s253_s16 }
  0x4a   : > { %p1141_p9 = scmp.ne.s32.totalorder %s253_s16, %s1140_s11  ;;  %p1149_p2 = scmp.lt.s32.totalorder %s1140_s11, %s1140_s11 }
  0x4c   : > { %p1143_p12 = pnand %p1141_p9, %p1378_p13  ;;  %p1150_p4 = por %p1149_p2, %p1148_p1 }
  0x4e   : > { %p1144_p0 = pneg %p1143_p12 }
  0x50   : > { %p1151_p8 = pnand %p1150_p4, %p1144_p0 }
  0x52   : > { %1154 = shalt.err (!%p1151_p8)
}
  0x53   : > { %1012 = dma.hbm_to_vmem [thread:$0]  (!%p1362_p11), %s1625_s5, 2048, %s253_s16, [#allocation9], %s1264_s13, %s1264_s13, %s1265_s15  }
  0x54   : > { %s1451_s22 = sadd.s32 1, %s1259_s27   ;;  %s32_s17 = sadd.s32 1, %s1255_s26 }
  0x55   : > { %s29_s12 = ssub.s32 %s1259_s27, %s1451_s22  ;;  %p39_p8 = scmp.ne.s32.totalorder %s1255_s26, %s1251_s25 }
  0x56   : > { %p30_p4 = scmp.eq.s32.totalorder %s29_s12, 0  ;;  %p40_p13 = scmp.eq.s32.totalorder %s1259_s27, 0 }
  0x57   : > { %p1024_p6 = scmp.lt.s32.totalorder %s1259_s27, 2  ;;  %p1638_p3 = scmp.eq.s32.totalorder %s1332_s28, 1 }
  0x58   : > { %s1461_s18 = scalar_select %p30_p4, %s1255_s26, %s32_s17  }
  0x59   : > { %p41_p10 = por %p40_p13, %p39_p8  ;;  %p1465_p5 = por %p1638_p3, %p39_p8 }
  0x5a   : > { %s269_s20 = sand.u32 1, %s1255_s26   ;;  %s745_s21 = sshll.u32 %s1259_s27, 7 }
  0x5b   : > { %s744_s16 = sshll.u32 %s269_s20, 3  ;;  %s1474_s23 = scalar_lea.hbm %s1620_s0, %s745_s21 }
  0x5c   : > { %s273_s29 = scalar_lea.vmem [#allocation2], %s744_s16  ;;  %p1476_p11 = pnand %p1024_p6, %p41_p10 }
  0x5d   : > { %s280_s10 = sshll.u32 %s273_s29, 4  ;;  %s270_s14 = scalar_lea.sflag [#allocation3], %s269_s20  ;;  %s1480_s10 = int_to_ptr.vmem [resolvable:$true] %s280_s10 }
  0x5e   : > { %s1155_s8 = scalar_lea.hbm %s1474_s23, 128  ;;  %p1157_p9 = pneg %p1476_p11 }
  0x5f   : > { %p1156_p7 = scmp.ne.s32.totalorder %s1474_s23, %s1155_s8  ;;  %s1160_s21 = scalar_lea.hbm %s1620_s0, 256 }
  0x60   : > { %p1161_p1 = scmp.lt.u32.totalorder %s1474_s23, %s1620_s0  ;;  %p1162_p2 = scmp.lt.u32.totalorder %s1160_s21, %s1155_s8 }
  0x61   : > { %p1158_p12 = pnand %p1157_p9, %p1156_p7  ;;  %p1164_p8 = scmp.lt.u32.totalorder %s1155_s8, %s1474_s23 }
  0x62   : > { %p1163_p4 = por %p1162_p2, %p1161_p1 }
  0x63   : > { %p1159_p0 = pneg %p1158_p12 }
  0x64   : > { %p1165_p13 = por %p1164_p8, %p1163_p4 }
  0x66   : > { %p1166_p6 = pnand %p1165_p13, %p1159_p0 }
  0x68   : > { %1169 = shalt.err (!%p1166_p6)
}
  0x69   : > { %s1170_s20 = scalar_lea.vmem %s1480_s10, 128  ;;  %s1266_s15 = smov [#allocation2]  }
  0x6a   : > { %p1171_p10 = scmp.ne.s32.totalorder %s1480_s10, %s1170_s20  ;;  %s1175_s29 = sshll.u32 %s1266_s15, 4  ;;  %s1176_s29 = int_to_ptr.vmem [resolvable:$false] %s1175_s29 }
  0x6b   : > { %s1177_s12 = scalar_lea.vmem %s1176_s29, 256  ;;  %p1178_p12 = scmp.lt.s32.totalorder %s1480_s10, %s1176_s29 }
  0x6c   : > { %p1173_p3 = pnand %p1171_p10, %p1157_p9  ;;  %p1179_p1 = scmp.lt.s32.totalorder %s1177_s12, %s1170_s20 }
  0x6e   : > { %p1174_p7 = pneg %p1173_p3  ;;  %p1180_p2 = por %p1179_p1, %p1178_p12 }
  0x70   : > { %p1181_p4 = pnand %p1180_p2, %p1174_p7 }
  0x72   : > { %1184 = shalt.err (!%p1181_p4)
}
  0x73   : > { %1016 = dma.hbm_to_vmem [thread:$0]  (!%p1476_p11), %s1474_s23, 128, %s1480_s10, %s270_s14  }
  0x74   : > { %p1641_p0 = scmp.ne.s32.totalorder %s1635_s9, 0 }
  0x75   : > { %s1510_s8 = sand.u32 (!%p1641_p0), 1, %s1251_s25   ;;  %p1642_p9 = scmp.ne.s32.totalorder (!%p1641_p0), %s1632_s30, 0 }
  0x76   : > { %289 = sbr.rel (%p1641_p0) target bundleno = 629 (0x275), region = 48  ;;  %s747_s17 = sshll.u32 (!%p1641_p0), %s1510_s8, 3 }
  0x77   : > { %s292_s21 = scalar_lea.sflag (!%p1641_p0), [#allocation3], %s1510_s8  ;;  %s1516_s16 = scalar_lea.vmem (!%p1641_p0), [#allocation2], %s747_s17 }
  0x7d   : > { %1230 = dma.done.wait (%p1642_p9), %s292_s21, 128  }
  0x7e   : > { %1232 = vsyncadd (%p1642_p9), %s292_s21, 4294967168  ;;  %p1643_p11 = scmp.eq.s32.totalorder %s1332_s28, 0 }
  0x80   : > { %1234 = dma.done.wait (%p1643_p11), [#allocation6], 4096   ;;  %p1644_p8 = pmov %p1643_p11 }
  0x82   : > { %1236 = vsyncadd (%p1644_p8), [#allocation6], 4294963200  ;;  %p1645_p13 = pmov %p1644_p8 }
  0x83   : > { %p1646_p6 = pmov %p1644_p8 }
  0x84   : > { %1238 = dma.done.wait (%p1645_p13), [#allocation9], 2048  }
  0x85   : > { %1240 = vsyncadd (%p1646_p6), [#allocation9], 4294965248  ;;  %v1267_v0 = vmov 0.0|0.0   ;;  %vm1268_vm0 = vmmov 0   ;;  %v1269_v1 = vmov 0.0   ;;  %v432_v2 = vld [vmem:[#allocation7] sm:$0xff] }
  0x86   : > { %939 = vmatprep.subr.bf16.mxu1 %v1267_v0  ;;  %915 = vmatprep.subr.bf16.mxu0 %v1267_v0  ;;  %v433_v3 = vld [vmem:[#allocation7 + $0x8] sm:$0xff]  ;;  %v434_v4 = vld [vmem:[#allocation7 + $0x10] sm:$0xff]  ;;  %v435_v6 = vld [vmem:[#allocation7 + $0x18] sm:$0xff]  ;;  %s756_s13 = sshll.u32 %s1332_s28, 7  ;;  %s337_s20 = scalar_lea.vmem [#allocation10], %s747_s17 }
  0x87   : > { %877 = vmatprep.mubr.msk.f32.mxu1 %vm1268_vm0, %v1269_v1  ;;  %842 = vmatprep.mubr.msk.f32.mxu0 %vm1268_vm0, %v1269_v1  ;;  %v940_v5 = vpack.c.bf16 %v433_v3, %v432_v2  ;;  %v339_v7 = vld [vmem:[#allocation5] sm:$0xff]  ;;  %v943_v8 = vpack.c.bf16 %v435_v6, %v434_v4  ;;  %v340_v10 = vld [vmem:[#allocation5 + $0x8] sm:$0xff]  ;;  %v341_v13 = vld [vmem:[#allocation5 + $0x10] sm:$0xff]  ;;  %s639_s15 = sshll.u32 %s337_s20, 4  ;;  %s1576_s21 = scalar_lea.hbm %s1627_s7, %s756_s13  ;;  %s1578_s15 = int_to_ptr.vmem [resolvable:$true] %s639_s15 }
  0x88   : > { %v436_v9 = vld [vmem:[#allocation7 + $0x20] sm:$0xff]  ;;  %v437_v11 = vld [vmem:[#allocation7 + $0x28] sm:$0xff]  ;;  %v916_v12 = vpack.c.bf16 %v340_v10, %v339_v7  ;;  %v342_v14 = vld [vmem:[#allocation5 + $0x18] sm:$0xff]  ;;  %s1185_s30 = scalar_lea.vmem %s1578_s15, 128  ;;  %s1270_s28 = smov [#allocation10]  }
  0x89   : > { %941 = vmatpush3.bf16.msra.mxu1 %v940_v5  ;;  %v919_v15 = vpack.c.bf16 %v342_v14, %v341_v13  ;;  %v946_v16 = vpack.c.bf16 %v437_v11, %v436_v9  ;;  %v343_v17 = vld [vmem:[#allocation5 + $0x20] sm:$0xff]  ;;  %v344_v18 = vld [vmem:[#allocation5 + $0x28] sm:$0xff]  ;;  %v438_v19 = vld [vmem:[#allocation7 + $0x30] sm:$0xff]  ;;  %p1186_p10 = scmp.ne.s32.totalorder %s1578_s15, %s1185_s30  ;;  %s1189_s17 = sshll.u32 %s1270_s28, 4  ;;  %s1190_s17 = int_to_ptr.vmem [resolvable:$false] %s1189_s17 }
  0x8a   : > { %942 = vmatprep.subr.bf16.mxu1 %v1267_v0  ;;  %917 = vmatpush3.bf16.msra.mxu0 %v916_v12  ;;  %v439_v20 = vld [vmem:[#allocation7 + $0x38] sm:$0xff]  ;;  %v922_v21 = vpack.c.bf16 %v344_v18, %v343_v17  ;;  %v345_v23 = vld [vmem:[#allocation5 + $0x30] sm:$0xff]  ;;  %v440_v25 = vld [vmem:[#allocation7 + $0x40] sm:$0xff]  ;;  %s1191_s9 = scalar_lea.vmem %s1190_s17, 256  ;;  %p1192_p12 = scmp.lt.s32.totalorder %s1578_s15, %s1190_s17 }
  0x8b   : > { %918 = vmatprep.subr.bf16.mxu0 %v1267_v0  ;;  %v949_v22 = vpack.c.bf16 %v439_v20, %v438_v19  ;;  %v346_v24 = vld [vmem:[#allocation5 + $0x38] sm:$0xff]  ;;  %v441_v26 = vld [vmem:[#allocation7 + $0x48] sm:$0xff]  ;;  %v347_v29 = vld [vmem:[#allocation5 + $0x40] sm:$0xff]  ;;  %p1187_p3 = pnand %p1186_p10, %p1465_p5  ;;  %p1193_p1 = scmp.lt.s32.totalorder %s1191_s9, %s1185_s30 }
  0x8c   : > { %v925_v27 = vpack.c.bf16 %v346_v24, %v345_v23  ;;  %v952_v28 = vpack.c.bf16 %v441_v26, %v440_v25  ;;  %v348_v30 = vld [vmem:[#allocation5 + $0x48] sm:$0xff]  ;;  %v442_v31 = vld [vmem:[#allocation7 + $0x50] sm:$0xff]  ;;  %v443_v32 = vld [vmem:[#allocation7 + $0x58] sm:$0xff] }
  0x8d   : > { %944 = vmatpush3.bf16.msra.mxu1 %v943_v8  ;;  %v928_v33 = vpack.c.bf16 %v348_v30, %v347_v29  ;;  %v955_v34 = vpack.c.bf16 %v443_v32, %v442_v31  ;;  %v349_v35 = vld [vmem:[#allocation5 + $0x50] sm:$0xff]  ;;  %v350_v36 = vld [vmem:[#allocation5 + $0x58] sm:$0xff]  ;;  %v444_v37 = vld [vmem:[#allocation7 + $0x60] sm:$0xff]  ;;  %p1188_p7 = pneg %p1187_p3  ;;  %p1194_p2 = por %p1193_p1, %p1192_p12 }
  0x8e   : > { %945 = vmatprep.subr.bf16.mxu1 %v1267_v0  ;;  %920 = vmatpush3.bf16.msra.mxu0 %v919_v15  ;;  %v445_v38 = vld [vmem:[#allocation7 + $0x68] sm:$0xff]  ;;  %v931_v39 = vpack.c.bf16 %v350_v36, %v349_v35  ;;  %v351_v41 = vld [vmem:[#allocation5 + $0x60] sm:$0xff]  ;;  %v446_v43 = vld [vmem:[#allocation7 + $0x70] sm:$0xff] }
  0x8f   : > { %921 = vmatprep.subr.bf16.mxu0 %v1267_v0  ;;  %v958_v40 = vpack.c.bf16 %v445_v38, %v444_v37  ;;  %v352_v42 = vld [vmem:[#allocation5 + $0x68] sm:$0xff]  ;;  %v447_v44 = vld [vmem:[#allocation7 + $0x78] sm:$0xff]  ;;  %v353_v47 = vld [vmem:[#allocation5 + $0x70] sm:$0xff]  ;;  %p1195_p4 = pnand %p1194_p2, %p1188_p7 }
  0x90   : > { %v934_v45 = vpack.c.bf16 %v352_v42, %v351_v41  ;;  %v961_v46 = vpack.c.bf16 %v447_v44, %v446_v43  ;;  %v354_v48 = vld [vmem:[#allocation5 + $0x78] sm:$0xff]  ;;  %v531_v51 = vld [vmem:[#allocation8] sm:$0xff]  ;;  %v532_v52 = vld [vmem:[#allocation8 + $0x8] sm:$0xff] }
  0x91   : > { %947 = vmatpush3.bf16.msra.mxu1 %v946_v16  ;;  %v937_v49 = vpack.c.bf16 %v354_v48, %v353_v47  ;;  %v338_v50 = vld [vmem:[%s1516_s16] sm:$0xff]  ;;  %v964_v53 = vpack.c.bf16 %v532_v52, %v531_v51  ;;  %v535_v57 = vld [vmem:[#allocation8 + $0x20] sm:$0xff]  ;;  %v536_v58 = vld [vmem:[#allocation8 + $0x28] sm:$0xff]  ;;  %s626_s16 = scalar_lea.sflag [#allocation4], %s1510_s8 }
  0x92   : > { %948 = vmatprep.subr.bf16.mxu1 %v1267_v0  ;;  %923 = vmatpush3.bf16.msra.mxu0 %v922_v21  ;;  %v533_v54 = vld [vmem:[#allocation8 + $0x10] sm:$0xff]  ;;  %v534_v55 = vld [vmem:[#allocation8 + $0x18] sm:$0xff]  ;;  %v970_v59 = vpack.c.bf16 %v536_v58, %v535_v57  ;;  %v539_v63 = vld [vmem:[#allocation8 + $0x40] sm:$0xff] }
  0x93   : > { %924 = vmatprep.subr.bf16.mxu0 %v1267_v0  ;;  %v967_v56 = vpack.c.bf16 %v534_v55, %v533_v54  ;;  %v537_v60 = vld [vmem:[#allocation8 + $0x30] sm:$0xff]  ;;  %v538_v61 = vld [vmem:[#allocation8 + $0x38] sm:$0xff]  ;;  %v540_v2 = vld [vmem:[#allocation8 + $0x48] sm:$0xff] }
  0x94   : > { %v973_v62 = vpack.c.bf16 %v538_v61, %v537_v60  ;;  %v541_v3 = vld [vmem:[#allocation8 + $0x50] sm:$0xff]  ;;  %v542_v4 = vld [vmem:[#allocation8 + $0x58] sm:$0xff]  ;;  %v543_v6 = vld [vmem:[#allocation8 + $0x60] sm:$0xff] }
  0x95   : > { %950 = vmatpush3.bf16.msra.mxu1 %v949_v22  ;;  %v979_v5 = vpack.c.bf16 %v542_v4, %v541_v3  ;;  %v544_v7 = vld [vmem:[#allocation8 + $0x68] sm:$0xff]  ;;  %v545_v9 = vld [vmem:[#allocation8 + $0x70] sm:$0xff]  ;;  %v546_v10 = vld [vmem:[#allocation8 + $0x78] sm:$0xff] }
  0x96   : > { %951 = vmatprep.subr.bf16.mxu1 %v1267_v0  ;;  %926 = vmatpush3.bf16.msra.mxu0 %v925_v27  ;;  %v982_v8 = vpack.c.bf16 %v544_v7, %v543_v6  ;;  %v985_v11 = vpack.c.bf16 %v546_v10, %v545_v9  ;;  %v753_v12 = vld [vmem:[%s1624_s4] ss:$0 sm:$0xff] }
  0x97   : > { %927 = vmatprep.subr.bf16.mxu0 %v1267_v0  ;;  %v754_v25 = vld [vmem:[%s1626_s6] ss:$0 sm:$0xff] }
  0x99   : > { %953 = vmatpush3.bf16.msra.mxu1 %v952_v28 }
  0x9a   : > { %954 = vmatprep.subr.bf16.mxu1 %v1267_v0  ;;  %929 = vmatpush3.bf16.msra.mxu0 %v928_v33 }
  0x9b   : > { %930 = vmatprep.subr.bf16.mxu0 %v1267_v0 }
  0x9d   : > { %956 = vmatpush3.bf16.msra.mxu1 %v955_v34 }
  0x9e   : > { %957 = vmatprep.subr.bf16.mxu1 %v1267_v0  ;;  %932 = vmatpush3.bf16.msra.mxu0 %v931_v39 }
  0x9f   : > { %933 = vmatprep.subr.bf16.mxu0 %v1267_v0 }
  0xa1   : > { %959 = vmatpush3.bf16.msra.mxu1 %v958_v40 }
  0xa2   : > { %960 = vmatprep.subr.bf16.mxu1 %v1267_v0  ;;  %935 = vmatpush3.bf16.msra.mxu0 %v934_v45 }
  0xa3   : > { %936 = vmatprep.subr.bf16.mxu0 %v1267_v0 }
  0xa5   : > { %962 = vmatpush3.bf16.msra.mxu1 %v961_v46 }
  0xa6   : > { %938 = vmatpush3.bf16.msra.mxu0 %v937_v49 }
  0xa7   : > { %963 = vmatprep.subr.bf16.mxu0 %v1267_v0 }
  0xa8   : > { %878 = vmatmul.mubr.f32.vlgmr.msra.gmra.mrb[0].mxu1 %v338_v50 }
  0xa9   : > { %843 = vmatmul.mubr.f32.vlgmr.msra.gmra.mrb[0].mxu0 %v338_v50 }
  0xaa   : > { %965 = vmatpush3.bf16.msra.mxu0 %v964_v53  ;;  %912 = vmatprep.mubr.msk.f32.mxu0 %vm1268_vm0, %v1269_v1  ;;  %v976_v1 = vpack.c.bf16 %v540_v2, %v539_v63 }
  0xab   : > { %966 = vmatprep.subr.bf16.mxu0 %v1267_v0 }
  0xae   : > { %968 = vmatpush3.bf16.msra.mxu0 %v967_v56 }
  0xaf   : > { %969 = vmatprep.subr.bf16.mxu0 %v1267_v0 }
  0xb2   : > { %971 = vmatpush3.bf16.msra.mxu0 %v970_v59 }
  0xb3   : > { %972 = vmatprep.subr.bf16.mxu0 %v1267_v0 }
  0xb6   : > { %974 = vmatpush3.bf16.msra.mxu0 %v973_v62 }
  0xb7   : > { %975 = vmatprep.subr.bf16.mxu0 %v1267_v0 }
  0xba   : > { %977 = vmatpush3.bf16.msra.mxu0 %v976_v1 }
  0xbb   : > { %978 = vmatprep.subr.bf16.mxu0 %v1267_v0 }
  0xbe   : > { %980 = vmatpush3.bf16.msra.mxu0 %v979_v5 }
  0xbf   : > { %981 = vmatprep.subr.bf16.mxu0 %v1267_v0 }
  0xc2   : > { %983 = vmatpush3.bf16.msra.mxu0 %v982_v8 }
  0xc3   : > { %984 = vmatprep.subr.bf16.mxu0 %v1267_v0  ;;  %v752_v0 = vld [vmem:[%s1623_s3] ss:$0 sm:$0xff] }
  0xc6   : > { %986 = vmatpush3.bf16.msra.mxu0 %v985_v11 }
 0x17b   : > { %v521_v13 = vpop.f32.mrb[0].mxu1 }
 0x17c   : > { %v522_v14 = vadd.f32 %v753_v12, %v521_v13  ;;  %v879_v15 = vpop.f32.mrb[1].mxu1  ;;  %v428_v17 = vpop.f32.mrb[0].mxu0 }
 0x17d   : > { %v844_v18 = vpop.f32.mrb[1].mxu0  ;;  %v429_v22 = vadd.f32 %v752_v0, %v428_v17 }
 0x17e   : > { %v526_v16 = vmul.f32 0.70710677, %v522_v14  ;;  %v525_v20 = vmul.f32 0.5, %v522_v14 }
 0x180   : > { %1069 = verf.f32 %v526_v16 }
 0x18a   : > { %v1070_v19 = vpop.eup %1069 }
 0x18b   : > { %v528_v21 = vadd.f32 1.0, %v1070_v19 }
 0x18d   : > { %v529_v23 = vmul.f32 %v528_v21, %v525_v20 }
 0x18f   : > { %v530_v24 = vmul.f32 %v529_v23, %v429_v22 }
 0x191   : > { %913 = vmatmul.mubr.f32.vlgmr.msra.gmra.mrb[2].mxu0 %v530_v24 }
 0x264   : > { %v620_v26 = vpop.f32.mrb[2].mxu0 }
 0x265   : > { %v621_v27 = vadd.f32 %v754_v25, %v620_v26  ;;  %v914_v28 = vpop.f32.mrb[3].mxu0 }
 0x267   : > { %624 = vst [vmem:[%s337_s20] sm:$0xff] %v621_v27 }
 0x268   : > { %1198 = shalt.err (!%p1195_p4)
}
 0x269   : > { %s1199_s8 = scalar_lea.hbm %s1576_s21, 128  ;;  %s1203_s11 = scalar_lea.hbm %s1627_s7, 256 }
 0x26a   : > { %p1200_p0 = scmp.ne.s32.totalorder %s1576_s21, %s1199_s8  ;;  %p1204_p8 = scmp.lt.u32.totalorder %s1576_s21, %s1627_s7 }
 0x26b   : > { %p1205_p13 = scmp.lt.u32.totalorder %s1203_s11, %s1199_s8  ;;  %p1207_p10 = scmp.lt.u32.totalorder %s1199_s8, %s1576_s21 }
 0x26c   : > { %p1201_p9 = pnand %p1200_p0, %p1465_p5 }
 0x26d   : > { %p1206_p6 = por %p1205_p13, %p1204_p8 }
 0x26e   : > { %p1202_p11 = pneg %p1201_p9 }
 0x26f   : > { %p1208_p3 = por %p1207_p10, %p1206_p6 }
 0x271   : > { %p1209_p7 = pnand %p1208_p3, %p1202_p11 }
 0x273   : > { %1212 = shalt.err (!%p1209_p7)
}
 0x274   : > { %1001 = dma.vmem_to_hbm [thread:$0]  (%p1465_p5), %s1578_s15, 128, %s1576_s21, %s626_s16  }
 0x275 PF: > { %s1647_s20 = sld [smem:[#allocation15_spill]]  ;;  %s651_s29 = sand.u32 1, %s1247_s24  }
 0x276   : > { %p1649_p1 = scmp.ge.s32.totalorder %s1259_s27, 2  ;;  %s652_s12 = scalar_lea.sflag [#allocation4], %s651_s29 }
 0x27b   : > { %p1648_p12 = scmp.ne.s32.totalorder %s1647_s20, 0 }
 0x27d   : > { %p1018_p2 = pnand %p1649_p1, %p1648_p12 }
 0x27f   : > { %1242 = dma.done.wait (!%p1018_p2), %s652_s12, 128  }
 0x280   : > { %1244 = vsyncadd (!%p1018_p2), %s652_s12, 4294967168  ;;  %p22_p4 = scmp.ge.s32.totalorder %s1451_s22, 4   ;;  %s1650_s24 = smov %s1251_s25 }
 0x281   : > { %s1651_s25 = smov %s1255_s26  ;;  %s1652_s26 = smov %s1461_s18 }
 0x282   : > { %s1653_s27 = smov %s1451_s22  ;;  %24 = sbr.rel (!%p22_p4) target bundleno = 7 (0x7), region = 105 }
 0x289   :  { %657 = vsyncpa [#allocation3], 1 }
 0x28a   :  { %659 = vsyncpa [#allocation3 + $0x1], 1 }
 0x28b   :  { %660 = vsyncpa [#allocation6], 1 }
 0x28c   :  { %661 = vsyncpa [#allocation9], 1 }
 0x28d   :  { %662 = vsyncpa [#allocation4], 1 }
 0x28e   :  { %664 = vsyncpa [#allocation4 + $0x1], 1 }

</bundles_post_ra>
